<compile_context>
chip_gen: v5e
topology: v5e:2x2
jax: 0.10.0
libtpu: 0.0.40
codegen_flags: <defaults>
</compile_context>

<pallas_src>
import functools

import jax
import jax.numpy as jnp
from jax import lax
from jax.experimental import pallas as pl
from jax.experimental.pallas import tpu as pltpu


def _dot_bt(a, b):
    """a @ b^T, contracting the last dim of both operands, f32 accumulation."""
    return lax.dot_general(
        a, b,
        dimension_numbers=(((1,), (1,)), ((), ())),
        preferred_element_type=jnp.float32,
    )


def _rnn_fc_kernel(x_ref, wih_ref, whh_ref, brnn_ref, wfc_ref, bfc_ref, out_ref,
                   *, batch, seq):
    # x_ref:    (T*B, I)  bf16, time-major rows (t fastest-varying over blocks of B)
    # wih_ref:  (H, I)    bf16  nn.RNN weight_ih_l0 (un-transposed)
    # whh_ref:  (H, H)    bf16  nn.RNN weight_hh_l0 (un-transposed)
    # brnn_ref: (1, H)    f32   b_ih + b_hh (folded once in the wrapper)
    # wfc_ref:  (O, H)    bf16  Linear weight (un-transposed)
    # bfc_ref:  (1, O)    f32   Linear bias
    # out_ref:  (B, O)    f32
    H = whh_ref.shape[0]

    # ---- Hoisted input projection: one bf16 MXU op for all timesteps,
    #      bias folded once.  Result stays in f32.
    xw = _dot_bt(x_ref[...], wih_ref[...]) + brnn_ref[...]          # (T*B, H) f32

    whh = whh_ref[...]                                              # bf16, vreg-resident

    # ---- Serial recurrence: one single-pass bf16 matmul + f32 add + f32 tanh
    #      per step on the critical path.  T is a small compile-time constant,
    #      so a static unroll is fine; switch to lax.fori_loop(..., unroll=True)
    #      once T grows beyond ~16.
    h = jnp.zeros((batch, H), jnp.float32)
    for t in range(seq):
        x_t = xw[t * batch:(t + 1) * batch, :]                      # contiguous rows
        h = jnp.tanh(x_t + _dot_bt(h.astype(jnp.bfloat16), whh))

    # ---- Final projection on the last hidden state.
    out_ref[...] = _dot_bt(h.astype(jnp.bfloat16), wfc_ref[...]) + bfc_ref[...]


def simple_rnn_forward(x, w_ih, w_hh, b_ih, b_hh, w_fc, b_fc):
    """x: (B, T, I) float32 (batch_first, like PyTorch). Returns (B, O) float32."""
    B, T, I = x.shape
    H = w_hh.shape[0]
    O = w_fc.shape[0]

    # Wrapper-side glue (all tiny XLA ops):
    #  * time-major + flatten x -> (T*B, I) so the kernel never reshapes a ref,
    #  * fold the two RNN biases once, shape biases (1, N) for clean 2-D vregs,
    #  * cast matmul operands to bf16 (single-pass MXU), biases stay f32.
    x_tm = jnp.transpose(x, (1, 0, 2)).reshape(T * B, I).astype(jnp.bfloat16)
    b_rnn = (b_ih + b_hh).reshape(1, H).astype(jnp.float32)
    bfc = b_fc.reshape(1, O).astype(jnp.float32)

    vmem = pl.BlockSpec(memory_space=pltpu.MemorySpace.VMEM)
    kernel = functools.partial(_rnn_fc_kernel, batch=B, seq=T)
    return pl.pallas_call(
        kernel,
        out_shape=jax.ShapeDtypeStruct((B, O), jnp.float32),
        in_specs=[vmem] * 6,
        out_specs=vmem,
    )(
        x_tm,
        w_ih.astype(jnp.bfloat16),
        w_hh.astype(jnp.bfloat16),
        b_rnn,
        w_fc.astype(jnp.bfloat16),
        bfc,
    )


def _reference_f32(x, w_ih, w_hh, b_ih, b_hh, w_fc, b_fc):
    """Pure-f32 reference (matches PyTorch math)."""
    B, T, I = x.shape
    H = w_hh.shape[0]
    h = jnp.zeros((B, H), jnp.float32)
    for t in range(T):
        h = jnp.tanh(x[:, t, :] @ w_ih.T + b_ih + h @ w_hh.T + b_hh)
    return h @ w_fc.T + b_fc


def _reference_bf16_matmul(x, w_ih, w_hh, b_ih, b_hh, w_fc, b_fc):
    """Reference with the same bf16-matmul / f32-accumulate scheme as the kernel."""
    B, T, I = x.shape
    H = w_hh.shape[0]
    xb = x.astype(jnp.bfloat16)
    wihb = w_ih.astype(jnp.bfloat16)
    whhb = w_hh.astype(jnp.bfloat16)
    wfcb = w_fc.astype(jnp.bfloat16)
    brnn = (b_ih + b_hh).astype(jnp.float32)
    h = jnp.zeros((B, H), jnp.float32)
    for t in range(T):
        pre = (_dot_bt(xb[:, t, :], wihb) + brnn
               + _dot_bt(h.astype(jnp.bfloat16), whhb))
        h = jnp.tanh(pre)
    return _dot_bt(h.astype(jnp.bfloat16), wfcb) + b_fc.astype(jnp.float32)


if __name__ == "__main__":
    # Small shapes consistent with the module: batch=2, seq=8, input=16,
    # hidden=32, output=4.
    B, T, I, H, O = 2, 8, 16, 32, 4

    key = jax.random.PRNGKey(0)
    kx, k1, k2, k3, k4, k5, k6 = jax.random.split(key, 7)

    # Deterministic parameter init (PyTorch-style uniform(-1/sqrt(H), 1/sqrt(H))).
    bound = 1.0 / jnp.sqrt(jnp.float32(H))
    w_ih = jax.random.uniform(k1, (H, I), jnp.float32, -bound, bound)
    w_hh = jax.random.uniform(k2, (H, H), jnp.float32, -bound, bound)
    b_ih = jax.random.uniform(k3, (H,), jnp.float32, -bound, bound)
    b_hh = jax.random.uniform(k4, (H,), jnp.float32, -bound, bound)
    w_fc = jax.random.uniform(k5, (O, H), jnp.float32, -bound, bound)
    b_fc = jax.random.uniform(k6, (O,), jnp.float32, -bound, bound)

    x = jax.random.normal(kx, (B, T, I), jnp.float32)

    out = simple_rnn_forward(x, w_ih, w_hh, b_ih, b_hh, w_fc, b_fc)
    out = jax.block_until_ready(out)
    assert out.shape == (B, O)

    # Tight check vs a reference using the same bf16-matmul / f32-accumulate scheme.
    ref_matched = _reference_bf16_matmul(x, w_ih, w_hh, b_ih, b_hh, w_fc, b_fc)
    assert jnp.allclose(out, ref_matched, atol=2e-3, rtol=2e-3), \
        "mismatch vs bf16-matched JAX reference"

    # Loose check vs the pure-f32 reference (kernel intentionally uses bf16 MXU inputs).
    ref_f32 = _reference_f32(x, w_ih, w_hh, b_ih, b_hh, w_fc, b_fc)
    assert jnp.allclose(out, ref_f32, atol=5e-2, rtol=5e-2), \
        "mismatch vs f32 JAX reference"

    print("KERNEL_OK")
</pallas_src>

<mosaic_0001>
module attributes {stable_mosaic.version = 11 : i64} {
  func.func @_rnn_fc_kernel(%arg0: memref<16x16xbf16, #tpu.memory_space<vmem>>, %arg1: memref<32x16xbf16, #tpu.memory_space<vmem>>, %arg2: memref<32x32xbf16, #tpu.memory_space<vmem>>, %arg3: memref<1x32xf32, #tpu.memory_space<vmem>>, %arg4: memref<4x32xbf16, #tpu.memory_space<vmem>>, %arg5: memref<1x4xf32, #tpu.memory_space<vmem>>, %arg6: memref<2x4xf32, #tpu.memory_space<vmem>>) attributes {dimension_semantics = [], scalar_prefetch = 0 : i64, scratch_operands = 0 : i64, tpu.core_type = #tpu.core_type<tc>} {
    %c0 = arith.constant 0 : index
    %c0_0 = arith.constant 0 : index
    %0 = vector.load %arg0[%c0, %c0_0] : memref<16x16xbf16, #tpu.memory_space<vmem>>, vector<16x16xbf16>
    %c0_1 = arith.constant 0 : index
    %c0_2 = arith.constant 0 : index
    %1 = vector.load %arg1[%c0_1, %c0_2] : memref<32x16xbf16, #tpu.memory_space<vmem>>, vector<32x16xbf16>
    %cst = arith.constant dense<0.000000e+00> : vector<16x32xf32>
    %2 = tpu.matmul %0, %1, %cst {dimension_numbers = #tpu.dot_dimension_numbers<[1], [1], [0], [0], [0, 0, 1, 0], [], []>} : vector<16x16xbf16>, vector<32x16xbf16>, vector<16x32xf32> -> vector<16x32xf32>
    %c0_3 = arith.constant 0 : index
    %c0_4 = arith.constant 0 : index
    %3 = vector.load %arg3[%c0_3, %c0_4] : memref<1x32xf32, #tpu.memory_space<vmem>>, vector<1x32xf32>
    %4 = vector.broadcast %3 : vector<1x32xf32> to vector<16x32xf32>
    %5 = arith.addf %2, %4 : vector<16x32xf32>
    %c0_5 = arith.constant 0 : index
    %c0_6 = arith.constant 0 : index
    %6 = vector.load %arg2[%c0_5, %c0_6] : memref<32x32xbf16, #tpu.memory_space<vmem>>, vector<32x32xbf16>
    %cst_7 = arith.constant 0.000000e+00 : f32
    %7 = vector.broadcast %cst_7 : f32 to vector<2x32xf32>
    %8 = vector.extract_strided_slice %5 {offsets = [0, 0], sizes = [2, 32], strides = [1, 1]} : vector<16x32xf32> to vector<2x32xf32>
    %9 = arith.truncf %7 : vector<2x32xf32> to vector<2x32xbf16>
    %cst_8 = arith.constant dense<0.000000e+00> : vector<2x32xf32>
    %10 = tpu.matmul %9, %6, %cst_8 {dimension_numbers = #tpu.dot_dimension_numbers<[1], [1], [0], [0], [0, 0, 1, 0], [], []>} : vector<2x32xbf16>, vector<32x32xbf16>, vector<2x32xf32> -> vector<2x32xf32>
    %11 = arith.addf %8, %10 : vector<2x32xf32>
    %12 = math.tanh %11 : vector<2x32xf32>
    %13 = vector.extract_strided_slice %5 {offsets = [2, 0], sizes = [2, 32], strides = [1, 1]} : vector<16x32xf32> to vector<2x32xf32>
    %14 = arith.truncf %12 : vector<2x32xf32> to vector<2x32xbf16>
    %cst_9 = arith.constant dense<0.000000e+00> : vector<2x32xf32>
    %15 = tpu.matmul %14, %6, %cst_9 {dimension_numbers = #tpu.dot_dimension_numbers<[1], [1], [0], [0], [0, 0, 1, 0], [], []>} : vector<2x32xbf16>, vector<32x32xbf16>, vector<2x32xf32> -> vector<2x32xf32>
    %16 = arith.addf %13, %15 : vector<2x32xf32>
    %17 = math.tanh %16 : vector<2x32xf32>
    %18 = vector.extract_strided_slice %5 {offsets = [4, 0], sizes = [2, 32], strides = [1, 1]} : vector<16x32xf32> to vector<2x32xf32>
    %19 = arith.truncf %17 : vector<2x32xf32> to vector<2x32xbf16>
    %cst_10 = arith.constant dense<0.000000e+00> : vector<2x32xf32>
    %20 = tpu.matmul %19, %6, %cst_10 {dimension_numbers = #tpu.dot_dimension_numbers<[1], [1], [0], [0], [0, 0, 1, 0], [], []>} : vector<2x32xbf16>, vector<32x32xbf16>, vector<2x32xf32> -> vector<2x32xf32>
    %21 = arith.addf %18, %20 : vector<2x32xf32>
    %22 = math.tanh %21 : vector<2x32xf32>
    %23 = vector.extract_strided_slice %5 {offsets = [6, 0], sizes = [2, 32], strides = [1, 1]} : vector<16x32xf32> to vector<2x32xf32>
    %24 = arith.truncf %22 : vector<2x32xf32> to vector<2x32xbf16>
    %cst_11 = arith.constant dense<0.000000e+00> : vector<2x32xf32>
    %25 = tpu.matmul %24, %6, %cst_11 {dimension_numbers = #tpu.dot_dimension_numbers<[1], [1], [0], [0], [0, 0, 1, 0], [], []>} : vector<2x32xbf16>, vector<32x32xbf16>, vector<2x32xf32> -> vector<2x32xf32>
    %26 = arith.addf %23, %25 : vector<2x32xf32>
    %27 = math.tanh %26 : vector<2x32xf32>
    %28 = vector.extract_strided_slice %5 {offsets = [8, 0], sizes = [2, 32], strides = [1, 1]} : vector<16x32xf32> to vector<2x32xf32>
    %29 = arith.truncf %27 : vector<2x32xf32> to vector<2x32xbf16>
    %cst_12 = arith.constant dense<0.000000e+00> : vector<2x32xf32>
    %30 = tpu.matmul %29, %6, %cst_12 {dimension_numbers = #tpu.dot_dimension_numbers<[1], [1], [0], [0], [0, 0, 1, 0], [], []>} : vector<2x32xbf16>, vector<32x32xbf16>, vector<2x32xf32> -> vector<2x32xf32>
    %31 = arith.addf %28, %30 : vector<2x32xf32>
    %32 = math.tanh %31 : vector<2x32xf32>
    %33 = vector.extract_strided_slice %5 {offsets = [10, 0], sizes = [2, 32], strides = [1, 1]} : vector<16x32xf32> to vector<2x32xf32>
    %34 = arith.truncf %32 : vector<2x32xf32> to vector<2x32xbf16>
    %cst_13 = arith.constant dense<0.000000e+00> : vector<2x32xf32>
    %35 = tpu.matmul %34, %6, %cst_13 {dimension_numbers = #tpu.dot_dimension_numbers<[1], [1], [0], [0], [0, 0, 1, 0], [], []>} : vector<2x32xbf16>, vector<32x32xbf16>, vector<2x32xf32> -> vector<2x32xf32>
    %36 = arith.addf %33, %35 : vector<2x32xf32>
    %37 = math.tanh %36 : vector<2x32xf32>
    %38 = vector.extract_strided_slice %5 {offsets = [12, 0], sizes = [2, 32], strides = [1, 1]} : vector<16x32xf32> to vector<2x32xf32>
    %39 = arith.truncf %37 : vector<2x32xf32> to vector<2x32xbf16>
    %cst_14 = arith.constant dense<0.000000e+00> : vector<2x32xf32>
    %40 = tpu.matmul %39, %6, %cst_14 {dimension_numbers = #tpu.dot_dimension_numbers<[1], [1], [0], [0], [0, 0, 1, 0], [], []>} : vector<2x32xbf16>, vector<32x32xbf16>, vector<2x32xf32> -> vector<2x32xf32>
    %41 = arith.addf %38, %40 : vector<2x32xf32>
    %42 = math.tanh %41 : vector<2x32xf32>
    %43 = vector.extract_strided_slice %5 {offsets = [14, 0], sizes = [2, 32], strides = [1, 1]} : vector<16x32xf32> to vector<2x32xf32>
    %44 = arith.truncf %42 : vector<2x32xf32> to vector<2x32xbf16>
    %cst_15 = arith.constant dense<0.000000e+00> : vector<2x32xf32>
    %45 = tpu.matmul %44, %6, %cst_15 {dimension_numbers = #tpu.dot_dimension_numbers<[1], [1], [0], [0], [0, 0, 1, 0], [], []>} : vector<2x32xbf16>, vector<32x32xbf16>, vector<2x32xf32> -> vector<2x32xf32>
    %46 = arith.addf %43, %45 : vector<2x32xf32>
    %47 = math.tanh %46 : vector<2x32xf32>
    %48 = arith.truncf %47 : vector<2x32xf32> to vector<2x32xbf16>
    %c0_16 = arith.constant 0 : index
    %c0_17 = arith.constant 0 : index
    %49 = vector.load %arg4[%c0_16, %c0_17] : memref<4x32xbf16, #tpu.memory_space<vmem>>, vector<4x32xbf16>
    %cst_18 = arith.constant dense<0.000000e+00> : vector<2x4xf32>
    %50 = tpu.matmul %48, %49, %cst_18 {dimension_numbers = #tpu.dot_dimension_numbers<[1], [1], [0], [0], [0, 0, 1, 0], [], []>} : vector<2x32xbf16>, vector<4x32xbf16>, vector<2x4xf32> -> vector<2x4xf32>
    %c0_19 = arith.constant 0 : index
    %c0_20 = arith.constant 0 : index
    %51 = vector.load %arg5[%c0_19, %c0_20] : memref<1x4xf32, #tpu.memory_space<vmem>>, vector<1x4xf32>
    %52 = vector.broadcast %51 : vector<1x4xf32> to vector<2x4xf32>
    %53 = arith.addf %50, %52 : vector<2x4xf32>
    %c0_21 = arith.constant 0 : index
    %c0_22 = arith.constant 0 : index
    %54 = vector.load %arg6[%c0_21, %c0_22] : memref<2x4xf32, #tpu.memory_space<vmem>>, vector<2x4xf32>
    tpu.vector_store %arg6[%c0_21, %c0_22], %53 {strides = array<i32>} : memref<2x4xf32, #tpu.memory_space<vmem>>, vector<2x4xf32>,
    return
  }
}

</mosaic_0001>

<bundles_post_ra>
// kernel: tpu_custom_call.1
= control target key start
LH: loop header
LB: loop body
LE: loop exit
PB: predicated region body
PF: predicated region fallthrough
CT: control target
= control target key end

     0   :  { %11 = vsyncpa [#allocation3], 0  ;;  %s520_s0 = inlined_call_operand.vmem [shape: bf16[16,16], index: 0, kind: input, shape index: {}]   ;;  %s521_s1 = inlined_call_operand.vmem [shape: bf16[32,16], index: 1, kind: input, shape index: {}]   ;;  %s522_s2 = inlined_call_operand.vmem [shape: bf16[32,32], index: 2, kind: input, shape index: {}]   ;;  %s523_s3 = inlined_call_operand.hbm [shape: f32[1,32], index: 3, kind: input, shape index: {}]   ;;  %s524_s4 = inlined_call_operand.vmem [shape: bf16[4,32], index: 4, kind: input, shape index: {}]   ;;  %s525_s5 = inlined_call_operand.vmem [shape: f32[1,4], index: 5, kind: input, shape index: {}]   ;;  %s526_s6 = inlined_call_operand.hbm [shape: f32[2,4], index: 6, kind: output, shape index: {}]  }
   0x1   :  { %12 = vsyncpa [#allocation4], 0  ;;  %s24_s23 = sshll.u32 %s523_s3, 4  ;;  %s441_s24 = smov [#allocation2]   ;;  %s25_s23 = int_to_ptr.hbm [resolvable:$true] %s24_s23 }
   0x2   :  { %s26_s25 = sshll.u32 %s441_s24, 4  ;;  %s27_s25 = int_to_ptr.vmem [resolvable:$true] %s26_s25 }
   0x3   :  { %29 = dma.hbm_to_vmem [thread:$0]  %s25_s23, 16, %s27_s25, [#allocation3]  }
   0x4   :  { %437 = dma.done.wait [#allocation3], 16  }
   0x5   :  { %438 = vsyncadd [#allocation3], 4294967280  ;;  %vm64_vm0 = vcmask 130048   ;;  %vm102_vm1 = vcmask 261120   ;;  %v365_v0 = vld [vmem:[%s521_s1 + $0x8] sm:$0xff]  ;;  %v364_v4 = vld [vmem:[%s521_s1] sm:$0xff] }
   0x6   :  { %v367_v1 = vld [vmem:[%s522_s2 + $0x8] sm:$0xff]  ;;  %v72_v2 = vsel %vm64_vm0, %v365_v0, 0  ;;  %v366_v5 = vld [vmem:[%s522_s2] sm:$0xff]  ;;  %v69_v6 = vsel %vm64_vm0, %v364_v4, 0  ;;  %v442_v9 = vmov 0   ;;  %s443_s12 = smov [#allocation5]  }
   0x7   :  { %v110_v3 = vsel %vm102_vm1, %v367_v1, 0  ;;  %80 = vmatpush.bf16.xpose.msra.mxu0 %v72_v2  ;;  %v107_v7 = vsel %vm102_vm1, %v366_v5, 0  ;;  %v363_v8 = vld [vmem:[%s520_s0] sm:$0xff]  ;;  %s322_s13 = sshll.u32 %s443_s12, 4  ;;  %s324_s15 = sshll.u32 %s526_s6, 4  ;;  %vm315_vm2 = vcmask 25600   ;;  %s323_s13 = int_to_ptr.vmem [resolvable:$true] %s322_s13  ;;  %s325_s15 = int_to_ptr.hbm [resolvable:$true] %s324_s15 }
   0x8   :  { %118 = vmatpush.bf16.xpose.msra.mxu1 %v110_v3  ;;  %137 = vmatpush.bf16.xpose.msra.mxu2 %v110_v3  ;;  %v371_v10 = vld [vmem:[#allocation2] ss:$0 sm:$0xff] }
   0x9   :  { %161 = vmatpush.bf16.xpose.msra.mxu3 %v110_v3  ;;  %v289_v60 = vld [vmem:[%s524_s4] sm:$0x3] }
   0xa   :  { %v300_v61 = vsel %vm102_vm1, %v289_v60, 0  ;;  %v372_v5 = vld [vmem:[%s525_s5] ss:$0 sm:$0xff] }
   0xf   :  { %81 = vmatpush.bf16.xpose.msra.mxu0 %v69_v6 }
  0x10   :  { %119 = vmatpush.bf16.xpose.msra.mxu1 %v107_v7  ;;  %138 = vmatpush.bf16.xpose.msra.mxu2 %v107_v7 }
  0x11   :  { %162 = vmatpush.bf16.xpose.msra.mxu3 %v107_v7 }
  0x16   :  { %346 = vmatmul.msk.bf16.vlgmr.msra.gmra.mxu0 %vm64_vm0, %v363_v8 }
  0x17   :  { %185 = vmatpush.bf16.xpose.msrb.mxu0 %v110_v3  ;;  %120 = vmatmul.bf16.vlgmr.msra.gmra.mxu1 %v442_v9 }
  0x18   :  { %209 = vmatpush.bf16.xpose.msrb.mxu1 %v110_v3  ;;  %228 = vmatpush.bf16.xpose.msrb.mxu2 %v110_v3 }
  0x19   :  { %252 = vmatpush.bf16.xpose.msrb.mxu3 %v110_v3 }
  0x1f   :  { %186 = vmatpush.bf16.xpose.msrb.mxu0 %v107_v7 }
  0x20   :  { %210 = vmatpush.bf16.xpose.msrb.mxu1 %v107_v7  ;;  %229 = vmatpush.bf16.xpose.msrb.mxu2 %v107_v7 }
  0x21   :  { %253 = vmatpush.bf16.xpose.msrb.mxu3 %v107_v7 }
  0x27   :  { %276 = vmatpush.bf16.xpose.msra.mxu0 %v110_v3 }
  0x28   :  { %309 = vmatpush.bf16.xpose.msra.mxu1 %v300_v61 }
  0x2f   :  { %277 = vmatpush.bf16.xpose.msra.mxu0 %v107_v7 }
  0x93   :  { %v83_v11 = vpop.f32.mrf.mxu0 }
  0x94   :  { %v121_v12 = vpop.f32.mrf.mxu1  ;;  %v84_v13 = vadd.f32 %v371_v10, %v83_v11 }
  0x96   :  { %v125_v14 = vadd.f32 %v121_v12, %v84_v13 }
  0x98   :  { %373 = vtanh.f32 %v125_v14 }
  0x9b   :  { %v85_v32 = vpop.f32.mrf.mxu0 }
  0x9c   :  { %v123_v15 = vpop.f32.mrf.mxu1  ;;  %v86_v40 = vadd.f32 %v371_v10, %v85_v32 }
  0x9e   :  { %v374_v16 = vpop.eup %373 }
  0x9f   :  { %v127_v17 = vpack.c.bf16 %v374_v16, %v374_v16 }
  0xa1   :  { %355 = vmatmul.msk.bf16.vlgmr.msra.gmra.mxu2 %vm102_vm1, %v127_v17 }
 0x124   :  { %v140_v18 = vpop.f32.mrf.mxu2 }
 0x125   :  { %v145_v19 = vrot.slane %v140_v18, 6 }
 0x127   :  { %v147_v20 = vadd.f32 %v145_v19, %v84_v13 }
 0x129   :  { %375 = vtanh.f32 %v147_v20 }
 0x12c   :  { %v142_v21 = vpop.f32.mrf.mxu2 }
 0x12f   :  { %v376_v22 = vpop.eup %375 }
 0x130   :  { %v149_v23 = vpack.c.bf16 %v376_v22, %v376_v22 }
 0x132   :  { %v151_v24 = vrot.slane %v149_v23, 1 }
 0x134   :  { %356 = vmatmul.msk.bf16.vlgmr.msra.gmra.mxu3 %vm102_vm1, %v151_v24 }
 0x1b7   :  { %v164_v25 = vpop.f32.mrf.mxu3 }
 0x1b8   :  { %v169_v26 = vrot.slane %v164_v25, 4 }
 0x1ba   :  { %v171_v27 = vadd.f32 %v169_v26, %v84_v13 }
 0x1bc   :  { %377 = vtanh.f32 %v171_v27 }
 0x1bf   :  { %v166_v28 = vpop.f32.mrf.mxu3 }
 0x1c2   :  { %v378_v29 = vpop.eup %377 }
 0x1c3   :  { %v173_v30 = vpack.c.bf16 %v378_v29, %v378_v29 }
 0x1c5   :  { %v175_v31 = vrot.slane %v173_v30, 2 }
 0x1c7   :  { %357 = vmatmul.msk.bf16.vlgmr.msrb.gmra.mxu0 %vm102_vm1, %v175_v31 }
 0x244   :  { %v188_v33 = vpop.f32.mrf.mxu0 }
 0x245   :  { %v193_v34 = vrot.slane %v188_v33, 2 }
 0x247   :  { %v195_v35 = vadd.f32 %v193_v34, %v84_v13 }
 0x249   :  { %379 = vtanh.f32 %v195_v35 }
 0x24c   :  { %v190_v36 = vpop.f32.mrf.mxu0 }
 0x24f   :  { %v380_v37 = vpop.eup %379 }
 0x250   :  { %v197_v38 = vpack.c.bf16 %v380_v37, %v380_v37 }
 0x252   :  { %v199_v39 = vrot.slane %v197_v38, 3 }
 0x254   :  { %358 = vmatmul.msk.bf16.vlgmr.msrb.gmra.mxu1 %vm102_vm1, %v199_v39 }
 0x2d1   :  { %v212_v41 = vpop.f32.mrf.mxu1 }
 0x2d2   :  { %v216_v42 = vadd.f32 %v212_v41, %v86_v40 }
 0x2d4   :  { %381 = vtanh.f32 %v216_v42 }
 0x2d9   :  { %v214_v43 = vpop.f32.mrf.mxu1 }
 0x2da   :  { %v382_v44 = vpop.eup %381 }
 0x2db   :  { %v218_v45 = vpack.c.bf16 %v382_v44, %v382_v44 }
 0x2dd   :  { %359 = vmatmul.msk.bf16.vlgmr.msrb.gmra.mxu2 %vm102_vm1, %v218_v45 }
 0x360   :  { %v231_v46 = vpop.f32.mrf.mxu2 }
 0x361   :  { %v236_v47 = vrot.slane %v231_v46, 6 }
 0x363   :  { %v238_v48 = vadd.f32 %v236_v47, %v86_v40 }
 0x365   :  { %383 = vtanh.f32 %v238_v48 }
 0x368   :  { %v233_v49 = vpop.f32.mrf.mxu2 }
 0x36b   :  { %v384_v50 = vpop.eup %383 }
 0x36c   :  { %v240_v51 = vpack.c.bf16 %v384_v50, %v384_v50 }
 0x36e   :  { %v242_v52 = vrot.slane %v240_v51, 1 }
 0x370   :  { %360 = vmatmul.msk.bf16.vlgmr.msrb.gmra.mxu3 %vm102_vm1, %v242_v52 }
 0x3f3   :  { %v255_v53 = vpop.f32.mrf.mxu3 }
 0x3f4   :  { %v260_v54 = vrot.slane %v255_v53, 4 }
 0x3f6   :  { %v262_v55 = vadd.f32 %v260_v54, %v86_v40 }
 0x3f8   :  { %385 = vtanh.f32 %v262_v55 }
 0x3fb   :  { %v257_v56 = vpop.f32.mrf.mxu3 }
 0x3fe   :  { %v386_v57 = vpop.eup %385 }
 0x3ff   :  { %v264_v58 = vpack.c.bf16 %v386_v57, %v386_v57 }
 0x401   :  { %v266_v59 = vrot.slane %v264_v58, 2 }
 0x403   :  { %361 = vmatmul.msk.bf16.vlgmr.msra.gmra.mxu0 %vm102_vm1, %v266_v59 }
 0x480   :  { %v279_v62 = vpop.f32.mrf.mxu0 }
 0x481   :  { %v284_v63 = vrot.slane %v279_v62, 2 }
 0x483   :  { %v286_v0 = vadd.f32 %v284_v63, %v86_v40 }
 0x485   :  { %387 = vtanh.f32 %v286_v0 }
 0x488   :  { %v281_v1 = vpop.f32.mrf.mxu0 }
 0x48b   :  { %v388_v2 = vpop.eup %387 }
 0x48c   :  { %v288_v3 = vpack.c.bf16 %v388_v2, %v388_v2 }
 0x48e   :  { %v295_v4 = vrot.slane %v288_v3, 3 }
 0x490   :  { %362 = vmatmul.msk.bf16.vlgmr.msra.gmra.mxu1 %vm102_vm1, %v295_v4 }
 0x50d   :  { %v311_v6 = vpop.f32.mrf.mxu1 }
 0x50e   :  { %v312_v7 = vadd.f32 %v372_v5, %v311_v6 }
 0x510   :  { %316 = vst.msk [vmem:[#allocation5] sm:$0x3] %vm315_vm2, %v312_v7 }
 0x511   :  { %327 = dma.vmem_to_hbm [thread:$0]  %s323_s13, 32, %s325_s15, [#allocation4]  }
 0x515   :  { %v313_v8 = vpop.f32.mrf.mxu1 }
 0x516   :  { %439 = dma.done.wait [#allocation4], 32  }
 0x517   :  { %440 = vsyncadd [#allocation4], 4294967264 }
 0x518   :  { %332 = vsyncpa [#allocation3], 1 }
 0x519   :  { %333 = vsyncpa [#allocation4], 1 }

</bundles_post_ra>
